<compile_context>
chip_gen: v6e
topology: v6e:2x2x1
jax: 0.10.0
libtpu: 0.0.40
codegen_flags: <defaults>
</compile_context>

<pallas_src>
import functools

import numpy as np

import jax
import jax.numpy as jnp
from jax.experimental import pallas as pl
from jax.experimental.pallas import tpu as pltpu


def _handshaking_pair_tile_kernel(ii_ref, jjs_ref, x_ref, w_ref, bias_ref,
                                  out_ref, ab_scr):
    # ii_ref / jjs_ref : (TP, 1) int32  — left index i, and (S + right index j)
    # x_ref            : (S, H)         — this batch's hidden states
    # w_ref            : (H, 2H)        — [W1^T | W2^T] fused
    # bias_ref         : (1, H)
    # out_ref          : (TP, H)        — one pair tile of the output
    # ab_scr           : (2S, H) VMEM   — rows [0,S): a+bias, rows [S,2S): b
    S, H = x_ref.shape
    TP = out_ref.shape[0]
    t = pl.program_id(1)

    # Fill the per-batch scratch once (pair-tile 0 of each batch).
    @pl.when(t == 0)
    def _():
        ab = jnp.dot(x_ref[...], w_ref[...],
                     preferred_element_type=jnp.float32)      # (S, 2H)
        ab_scr[0:S, :] = ab[:, :H] + bias_ref[...]            # a_i + bias
        ab_scr[S:2 * S, :] = ab[:, H:]                        # b_j

    # 2-hot selection matrix: row p has ones at columns i(p) and S + j(p),
    # so sel @ ab_scr == (a[i(p)] + bias) + b[j(p)] in a single MXU matmul.
    lanes = jax.lax.broadcasted_iota(jnp.int32, (TP, 2 * S), 1)
    sel = ((lanes == ii_ref[...]) | (lanes == jjs_ref[...])).astype(jnp.float32)
    gathered = jnp.dot(sel, ab_scr[...],
                       preferred_element_type=jnp.float32)    # (TP, H)

    out_ref[...] = jnp.tanh(gathered).astype(out_ref.dtype)


@functools.partial(jax.jit, static_argnames=("pair_tile",))
def handshaking_cat(seq_hiddens, weight, bias, *, pair_tile=256):
    """seq_hiddens: (B, S, H); weight: (H, 2H); bias: (H,).

    Returns (B, S*(S+1)//2, H) — same semantics as PyTorch HandshakingKernel
    forward with shaking_type='cat'.
    """
    B, S, H = seq_hiddens.shape
    P = S * (S + 1) // 2

    assert pair_tile % 8 == 0 and pair_tile > 0, "pair_tile must be a multiple of 8"
    n_ptiles = -(-P // pair_tile)          # cdiv
    P_pad = n_ptiles * pair_tile

    # Fused, pre-transposed weight: x @ wfused = [x @ W1^T | x @ W2^T].
    wfused = jnp.concatenate([weight[:, :H].T, weight[:, H:].T], axis=1)  # (H, 2H)
    bias2d = bias[None, :]                                                # (1, H)

    # Static flattened upper-triangular index tables (trace-time constants).
    ii_np = np.repeat(np.arange(S, dtype=np.int32), np.arange(S, 0, -1))
    jj_np = np.concatenate([np.arange(i, S, dtype=np.int32) for i in range(S)])
    pad = P_pad - P
    ii_np = np.pad(ii_np, (0, pad))        # padded rows index (0, 0): harmless,
    jj_np = np.pad(jj_np, (0, pad))        # sliced off below.
    ii2 = jnp.asarray(ii_np.reshape(P_pad, 1), dtype=jnp.int32)
    jjs2 = jnp.asarray((jj_np + S).reshape(P_pad, 1), dtype=jnp.int32)

    grid_spec = pltpu.PrefetchScalarGridSpec(
        num_scalar_prefetch=0,
        grid=(B, n_ptiles),                               # pair tiles innermost
        in_specs=[
            pl.BlockSpec((pair_tile, 1), lambda b, t: (t, 0)),   # i indices
            pl.BlockSpec((pair_tile, 1), lambda b, t: (t, 0)),   # S + j indices
            pl.BlockSpec((None, S, H), lambda b, t: (b, 0, 0)),  # x (per batch)
            pl.BlockSpec((H, 2 * H), lambda b, t: (0, 0)),       # fused weight
            pl.BlockSpec((1, H), lambda b, t: (0, 0)),           # bias
        ],
        out_specs=pl.BlockSpec((None, pair_tile, H), lambda b, t: (b, t, 0)),
        scratch_shapes=[pltpu.VMEM((2 * S, H), jnp.float32)],
    )

    out = pl.pallas_call(
        _handshaking_pair_tile_kernel,
        out_shape=jax.ShapeDtypeStruct((B, P_pad, H), seq_hiddens.dtype),
        grid_spec=grid_spec,
        compiler_params=pltpu.CompilerParams(
            dimension_semantics=("parallel", "arbitrary"),
            vmem_limit_bytes=32 * 1024 * 1024,
        ),
    )(ii2, jjs2, seq_hiddens, wfused, bias2d)

    return out[:, :P, :]


def handshaking_cat_ref(seq_hiddens, weight, bias):
    """Pure-JAX reference mirroring the PyTorch loop."""
    B, S, H = seq_hiddens.shape
    outs = []
    for ind in range(S):
        rep = jnp.broadcast_to(seq_hiddens[:, ind:ind + 1, :], (B, S - ind, H))
        vis = seq_hiddens[:, ind:, :]
        cat = jnp.concatenate([rep, vis], axis=-1)
        outs.append(jnp.tanh(cat @ weight.T + bias))
    return jnp.concatenate(outs, axis=1)


if __name__ == "__main__":
    B, S, H = 2, 8, 32

    key = jax.random.PRNGKey(0)
    kx, kw, kb = jax.random.split(key, 3)

    seq_hiddens = jax.random.normal(kx, (B, S, H), dtype=jnp.float32)
    # Deterministic synthetic parameters for combine_fc = Linear(2H -> H).
    weight = jax.random.normal(kw, (H, 2 * H), dtype=jnp.float32) * 0.05
    bias = jax.random.normal(kb, (H,), dtype=jnp.float32) * 0.05

    # pair_tile=16 -> P=36 padded to 48, 3 pair tiles per batch (exercises the
    # tiled-pair pipeline and the padded tail at small demo sizes).
    out = handshaking_cat(seq_hiddens, weight, bias, pair_tile=16)
    out = jax.block_until_ready(out)

    ref = handshaking_cat_ref(seq_hiddens, weight, bias)
    assert out.shape == (B, S * (S + 1) // 2, H), out.shape
    assert jnp.allclose(out, ref, atol=1e-5, rtol=1e-5), (
        float(jnp.max(jnp.abs(out - ref))))

    print("KERNEL_OK")
</pallas_src>

<mosaic_0001>
module attributes {stable_mosaic.version = 11 : i64} {
  func.func @_handshaking_pair_tile_kernel(%arg0: i32, %arg1: i32, %arg2: memref<16x1xi32, #tpu.memory_space<vmem>>, %arg3: memref<16x1xi32, #tpu.memory_space<vmem>>, %arg4: memref<1x8x32xf32, #tpu.memory_space<vmem>>, %arg5: memref<32x64xf32, #tpu.memory_space<vmem>>, %arg6: memref<1x32xf32, #tpu.memory_space<vmem>>, %arg7: memref<1x16x32xf32, #tpu.memory_space<vmem>>, %arg8: memref<16x32xf32, #tpu.memory_space<vmem>>) attributes {dimension_semantics = [#tpu.dimension_semantics<parallel>, #tpu.dimension_semantics<arbitrary>], iteration_bounds = array<i64: 2, 3>, scalar_prefetch = 0 : i64, scratch_operands = 1 : i64, tpu.core_type = #tpu.core_type<tc>, window_params = [{transform_indices = @transform_0, window_bounds = array<i64: 16, 1>}, {transform_indices = @transform_1, window_bounds = array<i64: 16, 1>}, {transform_indices = @transform_2, window_bounds = array<i64: 1, 8, 32>}, {pipeline_mode = #tpu.pipeline_mode<synchronous>, transform_indices = @transform_3, window_bounds = array<i64: 32, 64>}, {pipeline_mode = #tpu.pipeline_mode<synchronous>, transform_indices = @transform_4, window_bounds = array<i64: 1, 32>}, {transform_indices = @transform_5, window_bounds = array<i64: 1, 16, 32>}]} {
    %c0_i32 = arith.constant 0 : i32
    %0 = arith.cmpi eq, %arg1, %c0_i32 : i32
    %1 = arith.extui %0 : i1 to i32
    %c0_i32_0 = arith.constant 0 : i32
    %2 = arith.cmpi ne, %1, %c0_i32_0 : i32
    scf.if %2 {
      %c0_9 = arith.constant 0 : index
      %c0_10 = arith.constant 0 : index
      %c0_11 = arith.constant 0 : index
      %19 = vector.load %arg4[%c0_9, %c0_10, %c0_11] : memref<1x8x32xf32, #tpu.memory_space<vmem>>, vector<1x8x32xf32>
      %20 = vector.shape_cast %19 : vector<1x8x32xf32> to vector<8x32xf32>
      %c0_12 = arith.constant 0 : index
      %c0_13 = arith.constant 0 : index
      %21 = vector.load %arg5[%c0_12, %c0_13] : memref<32x64xf32, #tpu.memory_space<vmem>>, vector<32x64xf32>
      %cst_14 = arith.constant dense<0.000000e+00> : vector<8x64xf32>
      %22 = tpu.matmul %20, %21, %cst_14 {dimension_numbers = #tpu.dot_dimension_numbers<[1], [0], [0], [1], [0, 0, 1, 1], [], []>} : vector<8x32xf32>, vector<32x64xf32>, vector<8x64xf32> -> vector<8x64xf32>
      %23 = vector.extract_strided_slice %22 {offsets = [0, 0], sizes = [8, 32], strides = [1, 1]} : vector<8x64xf32> to vector<8x32xf32>
      %c0_15 = arith.constant 0 : index
      %c0_16 = arith.constant 0 : index
      %24 = vector.load %arg6[%c0_15, %c0_16] : memref<1x32xf32, #tpu.memory_space<vmem>>, vector<1x32xf32>
      %25 = vector.broadcast %24 : vector<1x32xf32> to vector<8x32xf32>
      %26 = arith.addf %23, %25 : vector<8x32xf32>
      %c0_17 = arith.constant 0 : index
      %c0_18 = arith.constant 0 : index
      %27 = vector.load %arg8[%c0_17, %c0_18] : memref<16x32xf32, #tpu.memory_space<vmem>>, vector<8x32xf32>
      tpu.vector_store %arg8[%c0_17, %c0_18], %26 {strides = array<i32>} : memref<16x32xf32, #tpu.memory_space<vmem>>, vector<8x32xf32>,
      %28 = vector.extract_strided_slice %22 {offsets = [0, 32], sizes = [8, 32], strides = [1, 1]} : vector<8x64xf32> to vector<8x32xf32>
      %c8 = arith.constant 8 : index
      %c0_19 = arith.constant 0 : index
      %29 = vector.load %arg8[%c8, %c0_19] : memref<16x32xf32, #tpu.memory_space<vmem>>, vector<8x32xf32>
      tpu.vector_store %arg8[%c8, %c0_19], %28 {strides = array<i32>} : memref<16x32xf32, #tpu.memory_space<vmem>>, vector<8x32xf32>,
    } else {
    }
    %3 = tpu.iota {dimensions = array<i32: 1>} : vector<16x16xi32>
    %c0 = arith.constant 0 : index
    %c0_1 = arith.constant 0 : index
    %4 = vector.load %arg2[%c0, %c0_1] : memref<16x1xi32, #tpu.memory_space<vmem>>, vector<16x1xi32>
    %5 = vector.broadcast %4 : vector<16x1xi32> to vector<16x16xi32>
    %6 = arith.cmpi eq, %3, %5 : vector<16x16xi32>
    %c0_2 = arith.constant 0 : index
    %c0_3 = arith.constant 0 : index
    %7 = vector.load %arg3[%c0_2, %c0_3] : memref<16x1xi32, #tpu.memory_space<vmem>>, vector<16x1xi32>
    %8 = vector.broadcast %7 : vector<16x1xi32> to vector<16x16xi32>
    %9 = arith.cmpi eq, %3, %8 : vector<16x16xi32>
    %10 = arith.ori %6, %9 : vector<16x16xi1>
    %11 = arith.extui %10 : vector<16x16xi1> to vector<16x16xi32>
    %12 = arith.sitofp %11 : vector<16x16xi32> to vector<16x16xf32>
    %c0_4 = arith.constant 0 : index
    %c0_5 = arith.constant 0 : index
    %13 = vector.load %arg8[%c0_4, %c0_5] : memref<16x32xf32, #tpu.memory_space<vmem>>, vector<16x32xf32>
    %cst = arith.constant dense<0.000000e+00> : vector<16x32xf32>
    %14 = tpu.matmul %12, %13, %cst {dimension_numbers = #tpu.dot_dimension_numbers<[1], [0], [0], [1], [0, 0, 1, 1], [], []>} : vector<16x16xf32>, vector<16x32xf32>, vector<16x32xf32> -> vector<16x32xf32>
    %15 = math.tanh %14 : vector<16x32xf32>
    %c0_6 = arith.constant 0 : index
    %c0_7 = arith.constant 0 : index
    %c0_8 = arith.constant 0 : index
    %16 = vector.load %arg7[%c0_6, %c0_7, %c0_8] : memref<1x16x32xf32, #tpu.memory_space<vmem>>, vector<1x16x32xf32>
    %17 = vector.shape_cast %16 : vector<1x16x32xf32> to vector<16x32xf32>
    %18 = vector.shape_cast %15 : vector<16x32xf32> to vector<1x16x32xf32>
    tpu.vector_store %arg7[%c0_6, %c0_7, %c0_8], %18 {strides = array<i32>} : memref<1x16x32xf32, #tpu.memory_space<vmem>>, vector<1x16x32xf32>,
    return
  }
  func.func @transform_0(%arg0: i32, %arg1: i32) -> (i32, i32) {
    %c0_i32 = arith.constant 0 : i32
    %c0_i32_0 = arith.constant 0 : i32
    return %arg1, %c0_i32 : i32, i32
  }
  func.func @transform_1(%arg0: i32, %arg1: i32) -> (i32, i32) {
    %c0_i32 = arith.constant 0 : i32
    %c0_i32_0 = arith.constant 0 : i32
    return %arg1, %c0_i32 : i32, i32
  }
  func.func @transform_2(%arg0: i32, %arg1: i32) -> (i32, i32, i32) {
    %c0_i32 = arith.constant 0 : i32
    %c0_i32_0 = arith.constant 0 : i32
    %c0_i32_1 = arith.constant 0 : i32
    return %arg0, %c0_i32, %c0_i32_0 : i32, i32, i32
  }
  func.func @transform_3(%arg0: i32, %arg1: i32) -> (i32, i32) {
    %c0_i32 = arith.constant 0 : i32
    %c0_i32_0 = arith.constant 0 : i32
    %c0_i32_1 = arith.constant 0 : i32
    return %c0_i32, %c0_i32_0 : i32, i32
  }
  func.func @transform_4(%arg0: i32, %arg1: i32) -> (i32, i32) {
    %c0_i32 = arith.constant 0 : i32
    %c0_i32_0 = arith.constant 0 : i32
    %c0_i32_1 = arith.constant 0 : i32
    return %c0_i32, %c0_i32_0 : i32, i32
  }
  func.func @transform_5(%arg0: i32, %arg1: i32) -> (i32, i32, i32) {
    %c0_i32 = arith.constant 0 : i32
    %c0_i32_0 = arith.constant 0 : i32
    return %arg0, %arg1, %c0_i32 : i32, i32, i32
  }
}

</mosaic_0001>

<bundles_post_ra>
// kernel: handshaking_cat.1
= control target key start
LH: loop header
LB: loop body
LE: loop exit
PB: predicated region body
PF: predicated region fallthrough
CT: control target
= control target key end

     0   :  { %s786_s18 = smov 0   ;;  %s788_s19 = smov 0   ;;  %s874_s0 = inlined_call_operand.vmem [shape: s32[48,1], index: 0, kind: input, shape index: {}]   ;;  %s875_s1 = inlined_call_operand.vmem [shape: s32[48,1], index: 1, kind: input, shape index: {}]   ;;  %s876_s2 = inlined_call_operand.vmem [shape: f32[2,8,32], index: 2, kind: input, shape index: {}]   ;;  %s877_s3 = inlined_call_operand.vmem [shape: f32[32,64], index: 3, kind: input, shape index: {}]   ;;  %s878_s4 = inlined_call_operand.vmem [shape: f32[1,32], index: 4, kind: input, shape index: {}]   ;;  %s879_s5 = inlined_call_operand.vmem [shape: f32[2,48,32], index: 5, kind: output, shape index: {}]  }
   0x1   :  { %s790_s20 = smov 0   ;;  %s792_s21 = smov 0  }
   0x2   :  { %s794_s22 = smov 0  }
   0x3 LB: > { %s24_s23 = sadd.s32 1, %s741_s20  ;;  %s27_s24 = sadd.s32 1, %s745_s21  ;;  %s749_s22 = sphi %s794_s22, %s15_s22   ;;  %s745_s21 = sphi %s792_s21, %s883_s21   ;;  %s741_s20 = sphi %s790_s20, %s882_s20   ;;  %s737_s19 = sphi %s788_s19, %s881_s19   ;;  %s733_s18 = sphi %s786_s18, %s880_s18  }
   0x4   : > { %p25_p0 = scmp.ge.s32.totalorder %s24_s23, 3  ;;  %p615_p1 = scmp.ge.s32.totalorder %s749_s22, 1 }
   0x5   : > { %p222_p2 = scmp.lt.s32.totalorder %s749_s22, 7 }
   0x6   : > { %s885_s23 = smov (%p25_p0, %s24_s23), 0  ;;  %s887_s24 = smov (!%p25_p0, %s27_s24), %s745_s21 }
   0x7   : > { %p223_p3 = pnand %p615_p1, %p222_p2  ;;  %p29_p4 = scmp.ge.s32.totalorder %s887_s24, 2 }
   0x8   : > { %s616_s25 = sshll.u32 (!%p223_p3), %s733_s18, 1  ;;  %p275_p5 = scmp.lt.s32.totalorder (!%p223_p3), %s737_s19, 1 }
   0x9   : > { %s889_s24 = smov (%p29_p4, %s887_s24), 0  ;;  %226 = sbr.rel (%p223_p3) target bundleno = 686 (0x2ae), region = 40 }
   0xa   : > { %p264_p6 = scmp.lt.s32.totalorder (!%p223_p3), %s616_s25, 5  ;;  %p623_p7 = scmp.ne.s32.totalorder (!%p223_p3), %s733_s18, 0 }
   0xe   : > { %s891_s19 = smov (!%p275_p5, %s737_s19), 1  ;;  %s893_s25 = smov (!%p264_p6, %s616_s25), 5 }
   0xf   : > { %s620_s26 = sshll.u32 %s891_s19, 3  ;;  %s659_s27 = smul.u32 6, %s891_s19 }
  0x10   : > { %s617_s28 = sshll.u32 %s893_s25, 3  ;;  %s278_s6 = scalar_lea.vmem %s876_s2, %s620_s26 }
  0x11   : > { %s825_s9 = scalar_lea.vmem %s874_s0, %s617_s28  ;;  %s830_s12 = scalar_lea.vmem %s875_s1, %s617_s28 }
  0x12   : > { %s285_s13 = sadd.s32 %s659_s27, %s893_s25  ;;  %292 = sbr.rel (%p623_p7) target bundleno = 341 (0x155), region = 44 }
  0x13   : > { %s622_s14 = sshll.u32 %s285_s13, 3  ;;  %s753_s10 = smov (!%p623_p7), 96  }
  0x14   : > { %s835_s17 = scalar_lea.vmem %s879_s5, %s622_s14 }
  0x17   : > { %v297_v0 = vld [vmem:[%s877_s3 + $0x18] sm:$0xff]  ;;  %v751_v1 = vmov 0.0   ;;  %v296_v2 = vld [vmem:[%s877_s3 + $0x10] sm:$0xff]  ;;  %vm752_vm0 = vmmov 0   ;;  %v295_v3 = vld [vmem:[%s877_s3 + $0x8] sm:$0xff]  ;;  %vm298_vm1 = vcmask 261120  }
  0x18   : > { %641 = vmatprep.subr.mxu0 %v751_v1  ;;  %649 = vmatprep.mubr.msk.f32.mxu0 %vm752_vm0, %v751_v1  ;;  %v294_v4 = vld [vmem:[%s877_s3] sm:$0xff] }
  0x19   : > { %642 = vmatpush3.msra.mxu0 %v297_v0  ;;  %v293_v5 = vld [vmem:[%s278_s6] sm:$0xff] }
  0x1a   : > { %643 = vmatprep.subr.mxu0 %v751_v1  ;;  %v625_v6 = vld [vmem:[%s878_s4] ss:$0 sm:$0xff] }
  0x1b   : > { %644 = vmatpush3.msra.mxu0 %v296_v2 }
  0x1c   : > { %645 = vmatprep.subr.mxu0 %v751_v1 }
  0x1d   : > { %646 = vmatpush3.msra.mxu0 %v295_v3 }
  0x1e   : > { %647 = vmatprep.subr.mxu0 %v751_v1 }
  0x1f   : > { %648 = vmatpush3.msra.mxu0 %v294_v4 }
  0x20   : > { %650 = vmatmul.mubr.msk.f32.vlgmr.msra.gmra.mxu0 %vm298_vm1, %v293_v5 }
  0xe0   : > { %v368_v7 = vpop.f32.mrf.mxu0 }
  0xe1   : > { %v379_v8 = vadd.f32 %v625_v6, %v368_v7  ;;  %382 = vrot.lane.b32.xlu0 %v368_v7, %s753_s10 }
  0xe2   : > { %v651_v9 = vpop.f32.mrf.mxu0 }
  0xe3   : > { %380 = vst.msk [vmem:[#allocation2] sm:$0xff] %vm298_vm1, %v379_v8 }
 0x153   : > { %v383_v10 = vpop.permute.xlu0 %382 }
 0x154   : > { %385 = vst.msk [vmem:[#allocation2 + $0x8] sm:$0xff] %vm298_vm1, %v383_v10 }
 0x155 PF: > { %v389_v11 = vld [vmem:[%s825_s9 + $0x8] sm:$0xff]  ;;  %v388_v12 = vld [vmem:[%s825_s9] sm:$0xff]  ;;  %v754_v13 = vmov 0   ;;  %v386_v18 = vlaneseq  ;;  %vm416_vm7 = vcmask 130048   ;;  %v755_v24 = vmov 0.0  }
 0x156   : > { %706 = vset.pattern.permute.xlu1 %v754_v13  ;;  %705 = vset.pattern.permute.xlu0 %v754_v13  ;;  %v399_v15 = vld [vmem:[%s830_s12 + $0x8] sm:$0xff]  ;;  %v398_v16 = vld [vmem:[%s830_s12] sm:$0xff]  ;;  %vm500_vm9 = vcmask 261120  }
 0x157   : > { %394 = vperm.xlu1 %706, %v389_v11   ;;  %391 = vperm.xlu0 %705, %v388_v12   ;;  %v414_v17 = vld [vmem:[#allocation2] sm:$0xff]  ;;  %v387_v21 = vand.u32 127, %v386_v18 }
 0x15b   : > { %v415_v14 = vld [vmem:[#allocation2 + $0x8] sm:$0xff]  ;;  %404 = vperm.xlu1 %706, %v399_v15   ;;  %401 = vperm.xlu0 %705, %v398_v16  }
 0x15c   : > { %652 = vmatprep.subr.mxu0 %v415_v14 }
 0x15d   : > { %653 = vmatpush3.msra.mxu0 %v415_v14 }
 0x15e   : > { %654 = vmatprep.subr.mxu0 %v414_v17 }
 0x15f   : > { %655 = vmatpush3.msra.mxu0 %v414_v17 }
 0x1d2   : > { %v395_v19 = vpop.permute.xlu1 %394  ;;  %v392_v20 = vpop.permute.xlu0 %391 }
 0x1d3   : > { %vm397_vm2 = vcmp.eq.s32.totalorder %v387_v21, %v395_v19  ;;  %vm396_vm5 = vcmp.eq.s32.totalorder %v387_v21, %v392_v20 }
 0x1d6   : > { %v405_v22 = vpop.permute.xlu1 %404  ;;  %v402_v23 = vpop.permute.xlu0 %401 }
 0x1d7   : > { %vm407_vm3 = vcmp.eq.s32.totalorder %v387_v21, %v405_v22  ;;  %vm406_vm4 = vcmp.eq.s32.totalorder %v387_v21, %v402_v23 }
 0x1d8   : > { %vm409_vm6 = vmor %vm397_vm2, %vm407_vm3 }
 0x1d9   : > { %vm408_vm8 = vmor %vm396_vm5, %vm406_vm4  ;;  %v627_v25 = vsel %vm409_vm6, 1.0, %v755_v24 }
 0x1da   : > { %v626_v26 = vsel %vm408_vm8, 1.0, %v755_v24 }
 0x1db   : > { %656 = vmatprep.mubr.msk.f32.mxu0 %vm416_vm7, %v626_v26 }
 0x1dc   : > { %657 = vmatmul.mubr.msk.f32.vlgmr.msra.gmra.mxu0 %vm416_vm7, %v627_v25 }
 0x29c   : > { %v658_v27 = vpop.f32.mrf.mxu0 }
 0x29d   : > { %707 = vtanh.f32 %v658_v27 }
 0x29e   : > { %v489_v28 = vpop.f32.mrf.mxu0 }
 0x29f   : > { %709 = vtanh.f32 %v489_v28 }
 0x2aa   : > { %v708_v29 = vpop.eup %707 }
 0x2ab   : > { %502 = vst.msk [vmem:[%s835_s17 + $0x8] sm:$0xff] %vm500_vm9, %v708_v29 }
 0x2ac   : > { %v710_v30 = vpop.eup %709 }
 0x2ad   : > { %501 = vst.msk [vmem:[%s835_s17] sm:$0xff] %vm500_vm9, %v710_v30 }
 0x2ae PF: > { %s15_s22 = sadd.s32 1, %s749_s22   ;;  %s880_s18 = smov %s741_s20 }
 0x2af   : > { %p12_p8 = scmp.ge.s32.totalorder %s15_s22, 8   ;;  %s881_s19 = smov %s745_s21 }
 0x2b0   : > { %s882_s20 = smov %s885_s23  ;;  %s883_s21 = smov %s889_s24 }
 0x2b1   :  { %14 = sbr.rel (!%p12_p8) target bundleno = 3 (0x3), region = 80 }

</bundles_post_ra>
